<compile_context>
chip_gen: v7x
topology: tpu7x:2x2x1
jax: 0.10.0
libtpu: 0.0.40
codegen_flags: <defaults>
</compile_context>

<pallas_src>
import jax
import jax.numpy as jnp
import numpy as np
from jax.experimental import pallas as pl
from jax.experimental.pallas import tpu as pltpu


# ----------------------------------------------------------------------------
# Kernel 1: random-walk landing probabilities.
#   Output (ksteps, N):  out[k-1, n] = diag(P^k)[n].
#   Only P^1..P^ceil(K/2) are built on the MXU; diag(P^(i+j)) is extracted as
#   colsum((P^i)^T * P^j)  (VPU elementwise + XLU sublane reduce).
# ----------------------------------------------------------------------------
def rw_landing_kernel(p_ref, o_ref):
    n = p_ref.shape[0]
    ksteps = o_ref.shape[0]

    p = p_ref[...]                                              # (N, N), f32
    rows = jax.lax.broadcasted_iota(jnp.int32, (n, n), 0)
    cols = jax.lax.broadcasted_iota(jnp.int32, (n, n), 1)
    eye = jnp.where(rows == cols, 1.0, 0.0).astype(jnp.float32)  # P^0

    max_half = (ksteps + 1) // 2
    powers = [eye, p]                                           # P^0, P^1
    for i in range(2, max_half + 1):                            # 3 matmuls for K=8
        powers.append(jnp.dot(powers[i // 2], powers[i - i // 2],
                              preferred_element_type=jnp.float32))
    # transposed powers for the "left" factor (XLU transposes, O(N^2))
    powers_t = [None] + [jnp.transpose(powers[i])
                         for i in range(1, max_half + 1)]

    for k in range(1, ksteps + 1):                              # static unroll
        i = (k + 1) // 2
        j = k - i
        # diag(P^k)[n] = sum_m P^i[n,m] * P^j[m,n] = colsum((P^i)^T ∘ P^j)[n]
        diag_row = jnp.sum(powers_t[i] * powers[j],
                           axis=0, keepdims=True)               # (1, N)
        o_ref[k - 1:k, :] = diag_row


def rw_landing_probs(P, ksteps):
    """diag(P^k) for k = 1..ksteps, returned as (N, ksteps)."""
    N = P.shape[0]
    out = pl.pallas_call(
        rw_landing_kernel,
        out_shape=jax.ShapeDtypeStruct((ksteps, N), jnp.float32),
        grid=(1,),
        in_specs=[pl.BlockSpec((N, N), lambda i: (0, 0))],
        out_specs=pl.BlockSpec((ksteps, N), lambda i: (0, 0)),
        compiler_params=pltpu.CompilerParams(
            dimension_semantics=("arbitrary",)),
    )(P)
    return out.T                                                # (N, ksteps)


# ----------------------------------------------------------------------------
# Kernel 2a / 2b: the two GCN S-aggregations, row-tiled over N.
#   layer1: H1[rows] = relu(S[rows, :] @ XW + b1_row)     XW = X@W1x + pe@W1p
#   layer2: HA[rows] = S[rows, :] @ H1
# The feature slab (lane axis = B*T*F, zero-padded to a multiple of 128) stays
# VMEM-resident (constant index_map); only the S row block changes per step.
# ----------------------------------------------------------------------------
def gcn_layer1_kernel(s_ref, xw_ref, b1_ref, o_ref):
    h = jnp.dot(s_ref[...], xw_ref[...],
                preferred_element_type=jnp.float32)             # (TM, Lp) f32
    h = h + b1_ref[...]                                         # (1, Lp) bcast
    o_ref[...] = jnp.maximum(h, 0.0).astype(o_ref.dtype)


def gcn_layer2_kernel(s_ref, h_ref, o_ref):
    o_ref[...] = jnp.dot(s_ref[...], h_ref[...],
                         preferred_element_type=jnp.float32).astype(o_ref.dtype)


def _gcn_layer_call(kernel, s, feat, extras, out_dtype, row_tile):
    N = s.shape[0]
    L = feat.shape[1]
    in_specs = [
        pl.BlockSpec((row_tile, N), lambda i: (i, 0)),          # S row block
        pl.BlockSpec((N, L), lambda i: (0, 0)),                 # resident slab
    ]
    args = [s, feat]
    for e in extras:
        in_specs.append(pl.BlockSpec(e.shape, lambda i: (0, 0)))
        args.append(e)
    return pl.pallas_call(
        kernel,
        out_shape=jax.ShapeDtypeStruct((N, L), out_dtype),
        grid=(N // row_tile,),
        in_specs=in_specs,
        out_specs=pl.BlockSpec((row_tile, L), lambda i: (i, 0)),
        compiler_params=pltpu.CompilerParams(
            dimension_semantics=("parallel",)),                 # v7x: 2 TCs
    )(*args)


# ----------------------------------------------------------------------------
# Wrapper: full GCN_RWSE forward.
# ----------------------------------------------------------------------------
def gcn_rwse_pallas(x, cirmat, params, *, row_tile=None,
                    matmul_dtype=jnp.float32):
    B, T, N, D = x.shape
    F = params["w1"].shape[0]
    BT = B * T

    # ---------------- positional encoding (shared, f32 throughout) ----------
    A = cirmat.astype(jnp.float32)
    deg_out = A.sum(axis=1)
    deg_inv = jnp.where(deg_out > 0, 1.0 / deg_out, 0.0)
    P = deg_inv[:, None] * A                                    # P = D^{-1} A

    pos_enc = rw_landing_probs(P, D)                            # (N, D) Pallas

    # BatchNorm1d (training-mode batch statistics, eps = 1e-5)
    mu = pos_enc.mean(axis=0)
    var = jnp.mean((pos_enc - mu) ** 2, axis=0)
    pe = (pos_enc - mu) / jnp.sqrt(var + 1e-5)
    pe = pe * params["bn_w"] + params["bn_b"]
    pe = pe @ params["pe_w"].T + params["pe_b"]                 # (N, D)

    # GCNConv normalized adjacency
    Ahat = A + jnp.eye(N, dtype=jnp.float32)
    deg_in = Ahat.sum(axis=0)
    dinv = jnp.where(deg_in > 0, 1.0 / jnp.sqrt(deg_in), 0.0)
    S = dinv[:, None] * Ahat.T * dinv[None, :]                  # (N, N)

    # ---------------- per-slice feature matmul W1x in the wrapper ----------
    w1x = params["w1"][:, :D].T                                 # (D, F)
    w1p = params["w1"][:, D:].T                                 # (D, F)
    xw = jnp.einsum("btnd,df->btnf", x.astype(jnp.float32), w1x)
    xw = xw + (pe @ w1p)[None, None]                            # fold PE (exact)
    xw_slab = jnp.transpose(xw, (2, 0, 1, 3)).reshape(N, BT * F)

    # lane-dense padding of the slab to a multiple of 128
    L = BT * F
    Lp = ((L + 127) // 128) * 128
    if Lp != L:
        xw_slab = jnp.pad(xw_slab, ((0, 0), (0, Lp - L)))
    b1_tiled = jnp.tile(params["b1"][None, :], (1, BT))         # (1, BT*F)
    if Lp != L:
        b1_tiled = jnp.pad(b1_tiled, ((0, 0), (0, Lp - L)))

    # row tile over N (largest multiple of 8 dividing N, capped)
    if row_tile is None:
        row_tile = N
        for t in (512, 256, 128, 64, 32, 16, 8):
            if t <= N and N % t == 0:
                row_tile = t
                break
    assert N % row_tile == 0 and (row_tile % 8 == 0 or row_tile == N)

    # cast matmul operands only; accumulation stays f32 inside the kernels
    s_c = S.astype(matmul_dtype)
    xw_c = xw_slab.astype(matmul_dtype)

    h1 = _gcn_layer_call(gcn_layer1_kernel, s_c, xw_c, [b1_tiled],
                         matmul_dtype, row_tile)                # (N, Lp)
    ha = _gcn_layer_call(gcn_layer2_kernel, s_c, h1, [],
                         jnp.float32, row_tile)                 # (N, Lp)

    # per-slice W2 matmul + bias in the wrapper
    ha = ha[:, :L].reshape(N, B, T, F).transpose(1, 2, 0, 3)    # (B, T, N, F)
    out = jnp.einsum("btnf,df->btnd", ha.astype(jnp.float32),
                     params["w2"]) + params["b2"]
    return out.astype(x.dtype)                                  # (B, T, N, D)


# ----------------------------------------------------------------------------
# Pure-JAX reference (mirrors the PyTorch semantics) for verification.
# ----------------------------------------------------------------------------
def gcn_rwse_reference(x, cirmat, params):
    B, T, N, D = x.shape
    A = cirmat.astype(jnp.float32)
    deg_out = A.sum(axis=1)
    deg_inv = jnp.where(deg_out > 0, 1.0 / deg_out, 0.0)
    P = deg_inv[:, None] * A
    Pk = P
    diags = []
    for _ in range(D):
        diags.append(jnp.diagonal(Pk))
        Pk = Pk @ P
    pos_enc = jnp.stack(diags, axis=1)                          # (N, D)

    mu = pos_enc.mean(axis=0)
    var = jnp.mean((pos_enc - mu) ** 2, axis=0)
    pe = (pos_enc - mu) / jnp.sqrt(var + 1e-5)
    pe = pe * params["bn_w"] + params["bn_b"]
    pe = pe @ params["pe_w"].T + params["pe_b"]

    Ahat = A + jnp.eye(N, dtype=jnp.float32)
    deg_in = Ahat.sum(axis=0)
    dinv = jnp.where(deg_in > 0, 1.0 / jnp.sqrt(deg_in), 0.0)
    S = dinv[:, None] * Ahat.T * dinv[None, :]

    h = jnp.concatenate(
        [x, jnp.broadcast_to(pe[None, None], (B, T, N, D))], axis=-1)
    y1 = jnp.einsum("ij,btjf->btif", S, h @ params["w1"].T) + params["b1"]
    y1 = jnp.maximum(y1, 0.0)
    out = jnp.einsum("ij,btjf->btif", S, y1 @ params["w2"].T) + params["b2"]
    return out


# ----------------------------------------------------------------------------
if __name__ == "__main__":
    B, T, N = 2, 3, 16
    d_model, d_ffn = 8, 16

    key = jax.random.PRNGKey(0)
    kx, k1, k2, k3, k4, k5, k6 = jax.random.split(key, 7)

    x = jax.random.normal(kx, (B, T, N, d_model), dtype=jnp.float32)

    # deterministic adjacency: ring + chords + a few symmetry-breaking edges
    A_np = np.zeros((N, N), dtype=np.float32)
    for i in range(N):
        A_np[i, (i + 1) % N] = 1.0
        A_np[(i + 1) % N, i] = 1.0
        A_np[i, (i + 5) % N] = 1.0
        A_np[(i + 5) % N, i] = 1.0
    A_np[0, 8] = A_np[8, 0] = 1.0
    A_np[2, 9] = A_np[9, 2] = 1.0
    A_np[3, 12] = A_np[12, 3] = 1.0
    np.fill_diagonal(A_np, 0.0)
    cirmat = jnp.asarray(A_np)

    params = {
        # BatchNorm1d(d_model) default init
        "bn_w": jnp.ones((d_model,), jnp.float32),
        "bn_b": jnp.zeros((d_model,), jnp.float32),
        # pe_encoder: Linear(d_model, d_model)
        "pe_w": 0.1 * jax.random.normal(k1, (d_model, d_model), jnp.float32),
        "pe_b": 0.1 * jax.random.normal(k2, (d_model,), jnp.float32),
        # conv1: GCNConv(2*d_model, d_ffn)
        "w1": 0.1 * jax.random.normal(k3, (d_ffn, 2 * d_model), jnp.float32),
        "b1": 0.1 * jax.random.normal(k4, (d_ffn,), jnp.float32),
        # conv2: GCNConv(d_ffn, d_model)
        "w2": 0.1 * jax.random.normal(k5, (d_model, d_ffn), jnp.float32),
        "b2": 0.1 * jax.random.normal(k6, (d_model,), jnp.float32),
    }

    ref = jax.block_until_ready(gcn_rwse_reference(x, cirmat, params))

    # f32 path (row_tile=8 -> grid=(2,), exercises the "parallel" row axis).
    # Tolerance slightly relaxed vs bit-level: the RWSE diag uses a different
    # (pairwise-power) matmul association than the sequential reference chain.
    out = jax.block_until_ready(
        gcn_rwse_pallas(x, cirmat, params, row_tile=8))
    np.testing.assert_allclose(np.asarray(out), np.asarray(ref),
                               rtol=5e-4, atol=5e-5)

    # bf16 matmul-operand path (v5e/v6e/v7x MXU-native); f32 accumulation,
    # RWSE / BatchNorm / PE pipeline stay f32 -> loose bf16 tolerance.
    out_bf16 = jax.block_until_ready(
        gcn_rwse_pallas(x, cirmat, params, row_tile=8,
                        matmul_dtype=jnp.bfloat16))
    np.testing.assert_allclose(np.asarray(out_bf16), np.asarray(ref),
                               rtol=5e-2, atol=1e-2)

    print("KERNEL_OK")
</pallas_src>

<mosaic_0001>
module attributes {stable_mosaic.version = 11 : i64} {
  func.func @rw_landing_kernel(%arg0: i32, %arg1: memref<16x16xf32, #tpu.memory_space<vmem>>, %arg2: memref<8x16xf32, #tpu.memory_space<vmem>>) attributes {dimension_semantics = [#tpu.dimension_semantics<arbitrary>], iteration_bounds = array<i64: 1>, scalar_prefetch = 0 : i64, scratch_operands = 0 : i64, tpu.core_type = #tpu.core_type<tc>, window_params = [{pipeline_mode = #tpu.pipeline_mode<synchronous>, transform_indices = @transform_0, window_bounds = array<i64: 16, 16>}, {pipeline_mode = #tpu.pipeline_mode<synchronous>, transform_indices = @transform_1, window_bounds = array<i64: 8, 16>}]} {
    %c0 = arith.constant 0 : index
    %c0_0 = arith.constant 0 : index
    %0 = vector.load %arg1[%c0, %c0_0] : memref<16x16xf32, #tpu.memory_space<vmem>>, vector<16x16xf32>
    %1 = tpu.iota {dimensions = array<i32: 0>} : vector<16x16xi32>
    %2 = tpu.iota {dimensions = array<i32: 1>} : vector<16x16xi32>
    %3 = arith.cmpi eq, %1, %2 : vector<16x16xi32>
    %cst = arith.constant 1.000000e+00 : f32
    %cst_1 = arith.constant 0.000000e+00 : f32
    %4 = vector.broadcast %cst : f32 to vector<16x16xf32>
    %5 = vector.broadcast %cst_1 : f32 to vector<16x16xf32>
    %6 = arith.select %3, %4, %5 : vector<16x16xi1>, vector<16x16xf32>
    %cst_2 = arith.constant dense<0.000000e+00> : vector<16x16xf32>
    %7 = tpu.matmul %0, %0, %cst_2 {dimension_numbers = #tpu.dot_dimension_numbers<[1], [0], [0], [1], [0, 0, 1, 1], [], []>} : vector<16x16xf32>, vector<16x16xf32>, vector<16x16xf32> -> vector<16x16xf32>
    %cst_3 = arith.constant dense<0.000000e+00> : vector<16x16xf32>
    %8 = tpu.matmul %0, %7, %cst_3 {dimension_numbers = #tpu.dot_dimension_numbers<[1], [0], [0], [1], [0, 0, 1, 1], [], []>} : vector<16x16xf32>, vector<16x16xf32>, vector<16x16xf32> -> vector<16x16xf32>
    %cst_4 = arith.constant dense<0.000000e+00> : vector<16x16xf32>
    %9 = tpu.matmul %7, %7, %cst_4 {dimension_numbers = #tpu.dot_dimension_numbers<[1], [0], [0], [1], [0, 0, 1, 1], [], []>} : vector<16x16xf32>, vector<16x16xf32>, vector<16x16xf32> -> vector<16x16xf32>
    %10 = tpu.transpose %0, [1, 0] : vector<16x16xf32> -> vector<16x16xf32>
    %11 = tpu.transpose %7, [1, 0] : vector<16x16xf32> -> vector<16x16xf32>
    %12 = tpu.transpose %8, [1, 0] : vector<16x16xf32> -> vector<16x16xf32>
    %13 = tpu.transpose %9, [1, 0] : vector<16x16xf32> -> vector<16x16xf32>
    %14 = arith.mulf %10, %6 : vector<16x16xf32>
    %cst_5 = arith.constant dense<0.000000e+00> : vector<16xf32>
    %15 = vector.multi_reduction <add>, %14, %cst_5 [0] : vector<16x16xf32> to vector<16xf32>
    %16 = vector.shape_cast %15 : vector<16xf32> to vector<1x16xf32>
    %c0_6 = arith.constant 0 : index
    %c0_7 = arith.constant 0 : index
    %17 = vector.load %arg2[%c0_6, %c0_7] : memref<8x16xf32, #tpu.memory_space<vmem>>, vector<1x16xf32>
    tpu.vector_store %arg2[%c0_6, %c0_7], %16 {strides = array<i32>} : memref<8x16xf32, #tpu.memory_space<vmem>>, vector<1x16xf32>,
    %18 = arith.mulf %10, %0 : vector<16x16xf32>
    %cst_8 = arith.constant dense<0.000000e+00> : vector<16xf32>
    %19 = vector.multi_reduction <add>, %18, %cst_8 [0] : vector<16x16xf32> to vector<16xf32>
    %20 = vector.shape_cast %19 : vector<16xf32> to vector<1x16xf32>
    %c1 = arith.constant 1 : index
    %c0_9 = arith.constant 0 : index
    %21 = vector.load %arg2[%c1, %c0_9] : memref<8x16xf32, #tpu.memory_space<vmem>>, vector<1x16xf32>
    tpu.vector_store %arg2[%c1, %c0_9], %20 {strides = array<i32>} : memref<8x16xf32, #tpu.memory_space<vmem>>, vector<1x16xf32>,
    %22 = arith.mulf %11, %0 : vector<16x16xf32>
    %cst_10 = arith.constant dense<0.000000e+00> : vector<16xf32>
    %23 = vector.multi_reduction <add>, %22, %cst_10 [0] : vector<16x16xf32> to vector<16xf32>
    %24 = vector.shape_cast %23 : vector<16xf32> to vector<1x16xf32>
    %c2 = arith.constant 2 : index
    %c0_11 = arith.constant 0 : index
    %25 = vector.load %arg2[%c2, %c0_11] : memref<8x16xf32, #tpu.memory_space<vmem>>, vector<1x16xf32>
    tpu.vector_store %arg2[%c2, %c0_11], %24 {strides = array<i32>} : memref<8x16xf32, #tpu.memory_space<vmem>>, vector<1x16xf32>,
    %26 = arith.mulf %11, %7 : vector<16x16xf32>
    %cst_12 = arith.constant dense<0.000000e+00> : vector<16xf32>
    %27 = vector.multi_reduction <add>, %26, %cst_12 [0] : vector<16x16xf32> to vector<16xf32>
    %28 = vector.shape_cast %27 : vector<16xf32> to vector<1x16xf32>
    %c3 = arith.constant 3 : index
    %c0_13 = arith.constant 0 : index
    %29 = vector.load %arg2[%c3, %c0_13] : memref<8x16xf32, #tpu.memory_space<vmem>>, vector<1x16xf32>
    tpu.vector_store %arg2[%c3, %c0_13], %28 {strides = array<i32>} : memref<8x16xf32, #tpu.memory_space<vmem>>, vector<1x16xf32>,
    %30 = arith.mulf %12, %7 : vector<16x16xf32>
    %cst_14 = arith.constant dense<0.000000e+00> : vector<16xf32>
    %31 = vector.multi_reduction <add>, %30, %cst_14 [0] : vector<16x16xf32> to vector<16xf32>
    %32 = vector.shape_cast %31 : vector<16xf32> to vector<1x16xf32>
    %c4 = arith.constant 4 : index
    %c0_15 = arith.constant 0 : index
    %33 = vector.load %arg2[%c4, %c0_15] : memref<8x16xf32, #tpu.memory_space<vmem>>, vector<1x16xf32>
    tpu.vector_store %arg2[%c4, %c0_15], %32 {strides = array<i32>} : memref<8x16xf32, #tpu.memory_space<vmem>>, vector<1x16xf32>,
    %34 = arith.mulf %12, %8 : vector<16x16xf32>
    %cst_16 = arith.constant dense<0.000000e+00> : vector<16xf32>
    %35 = vector.multi_reduction <add>, %34, %cst_16 [0] : vector<16x16xf32> to vector<16xf32>
    %36 = vector.shape_cast %35 : vector<16xf32> to vector<1x16xf32>
    %c5 = arith.constant 5 : index
    %c0_17 = arith.constant 0 : index
    %37 = vector.load %arg2[%c5, %c0_17] : memref<8x16xf32, #tpu.memory_space<vmem>>, vector<1x16xf32>
    tpu.vector_store %arg2[%c5, %c0_17], %36 {strides = array<i32>} : memref<8x16xf32, #tpu.memory_space<vmem>>, vector<1x16xf32>,
    %38 = arith.mulf %13, %8 : vector<16x16xf32>
    %cst_18 = arith.constant dense<0.000000e+00> : vector<16xf32>
    %39 = vector.multi_reduction <add>, %38, %cst_18 [0] : vector<16x16xf32> to vector<16xf32>
    %40 = vector.shape_cast %39 : vector<16xf32> to vector<1x16xf32>
    %c6 = arith.constant 6 : index
    %c0_19 = arith.constant 0 : index
    %41 = vector.load %arg2[%c6, %c0_19] : memref<8x16xf32, #tpu.memory_space<vmem>>, vector<1x16xf32>
    tpu.vector_store %arg2[%c6, %c0_19], %40 {strides = array<i32>} : memref<8x16xf32, #tpu.memory_space<vmem>>, vector<1x16xf32>,
    %42 = arith.mulf %13, %9 : vector<16x16xf32>
    %cst_20 = arith.constant dense<0.000000e+00> : vector<16xf32>
    %43 = vector.multi_reduction <add>, %42, %cst_20 [0] : vector<16x16xf32> to vector<16xf32>
    %44 = vector.shape_cast %43 : vector<16xf32> to vector<1x16xf32>
    %c7 = arith.constant 7 : index
    %c0_21 = arith.constant 0 : index
    %45 = vector.load %arg2[%c7, %c0_21] : memref<8x16xf32, #tpu.memory_space<vmem>>, vector<1x16xf32>
    tpu.vector_store %arg2[%c7, %c0_21], %44 {strides = array<i32>} : memref<8x16xf32, #tpu.memory_space<vmem>>, vector<1x16xf32>,
    return
  }
  func.func @transform_0(%arg0: i32) -> (i32, i32) {
    %c0_i32 = arith.constant 0 : i32
    %c0_i32_0 = arith.constant 0 : i32
    %c0_i32_1 = arith.constant 0 : i32
    return %c0_i32, %c0_i32_0 : i32, i32
  }
  func.func @transform_1(%arg0: i32) -> (i32, i32) {
    %c0_i32 = arith.constant 0 : i32
    %c0_i32_0 = arith.constant 0 : i32
    %c0_i32_1 = arith.constant 0 : i32
    return %c0_i32, %c0_i32_0 : i32, i32
  }
}

</mosaic_0001>

<bundles_post_ra>
// kernel: tpu_custom_call.1
= control target key start
LH: loop header
LB: loop body
LE: loop exit
PB: predicated region body
PF: predicated region fallthrough
CT: control target
= control target key end

     0   :  { %6 = vsyncpa [#allocation3], 0  ;;  %s699_s0 = inlined_call_operand.hbm [shape: f32[16,16], index: 0, kind: input, shape index: {}]   ;;  %s700_s1 = inlined_call_operand.hbm [shape: f32[8,16], index: 1, kind: output, shape index: {}]  }
   0x1   :  { %7 = vsyncpa [#allocation4], 0  ;;  %s616_s6 = smov [#allocation2]   ;;  %s568_s10 = scalar_lea.hbm %s699_s0, 256 }
   0x2   :  { %s13_s7 = sshll.u32 %s616_s6, 4  ;;  %p569_p0 = scmp.ne.s32.totalorder %s699_s0, %s568_s10  ;;  %s14_s7 = int_to_ptr.vmem [resolvable:$true] %s13_s7 }
   0x3   :  { %p572_p1 = scmp.lt.u32.totalorder %s568_s10, %s699_s0 }
   0x5   :  { %p574_p2 = pnand %p572_p1, %p569_p0 }
   0x7   :  { %577 = shalt.err (!%p574_p2)
}
   0x8   :  { %s578_s15 = scalar_lea.vmem %s14_s7, 256  ;;  %p583_p4 = scmp.lt.s32.totalorder %s14_s7, %s14_s7 }
   0x9   :  { %p579_p3 = scmp.ne.s32.totalorder %s14_s7, %s578_s15  ;;  %p584_p5 = scmp.lt.s32.totalorder %s578_s15, %s578_s15 }
   0xb   :  { %p585_p6 = por %p584_p5, %p583_p4 }
   0xd   :  { %p586_p7 = pnand %p585_p6, %p579_p3 }
   0xf   :  { %589 = shalt.err (!%p586_p7)
}
  0x10   :  { %s617_s16 = smov 128   ;;  %s618_s17 = smov 8  }
  0x11   :  { %19 = dma.hbm_to_vmem [thread:$0]  %s699_s0, 256, %s14_s7, [#allocation3], %s617_s16, %s617_s16, %s618_s17  }
  0x12   :  { %612 = dma.done.wait [#allocation3], 256  }
  0x13   :  { %613 = vsyncadd [#allocation3], 4294967040  ;;  %vm34_vm0 = vcmask 130048   ;;  %v23_v0 = vld [vmem:[#allocation2] sm:$0xff]  ;;  %v24_v1 = vld [vmem:[#allocation2 + $0x8] sm:$0xff]  ;;  %v25_v6 = vlaneseq  ;;  %v619_v13 = vmov 0.0  }
  0x14   :  { %v551_v2 = vpack.c.bf16 %v24_v1, %v23_v0  ;;  %534 = vmatprep.mubr.msk.f32.mxu0 %vm34_vm0, %v23_v0  ;;  %541 = vmatprep.mubr.msk.f32.mxu1 %vm34_vm0, %v23_v0  ;;  %vm411_vm3 = vcmask 122880   ;;  %s620_s0 = smov [#allocation5]  }
  0x15   :  { %272 = vxpose.xlu0.b32.start [1/2] (short) (narrow) %v23_v0, 16  ;;  %v26_v9 = vshrl.u32 %v25_v6, 7  ;;  %v29_v10 = vand.u32 127, %v25_v6  ;;  %s503_s20 = sshll.u32 %s620_s0, 4  ;;  %s504_s20 = int_to_ptr.vmem [resolvable:$true] %s503_s20 }
  0x16   :  { %552 = vmatprep.subr.bf16.mxu0 %v551_v2  ;;  %s590_s21 = scalar_lea.vmem %s504_s20, 128  ;;  %p595_p9 = scmp.lt.s32.totalorder %s504_s20, %s504_s20 }
  0x17   :  { %554 = vmatpush3.bf16.msra.mxu0 %v551_v2  ;;  %vm30_vm1 = vcmp.eq.s32.totalorder %v26_v9, %v29_v10  ;;  %v27_v11 = vadd.s32 8, %v26_v9  ;;  %p591_p8 = scmp.ne.s32.totalorder %s504_s20, %s590_s21  ;;  %p596_p10 = scmp.lt.s32.totalorder %s590_s21, %s590_s21 }
  0x18   :  { %v32_v14 = vsel %vm30_vm1, 1.0, %v619_v13 }
  0x19   :  { %273 = vxpose.xlu0.b32.end [2/2] (short) (narrow) %v24_v1, 16  ;;  %vm31_vm2 = vcmp.eq.s32.totalorder %v27_v11, %v29_v10  ;;  %p597_p11 = por %p596_p10, %p595_p9 }
  0x1a   :  { %535 = vmatmul.mubr.msk.f32.vlgmr.msra.gmra.mrb[0].mxu0 %vm34_vm0, %v24_v1  ;;  %v33_v18 = vsel %vm31_vm2, 1.0, %v619_v13 }
  0x1b   :  { %p598_p12 = pnand %p597_p11, %p591_p8 }
  0x95   :  { %v288_v7 = vpop.trf.xlu0 }
  0x96   :  { %v413_v8 = vmul.f32 %v288_v7, %v23_v0  ;;  %v400_v17 = vmul.f32 %v288_v7, %v32_v14 }
  0x98   :  { %v415_v15 = vsel %vm34_vm0, %v413_v8, 0.0  ;;  %v402_v20 = vsel %vm34_vm0, %v400_v17, 0.0 }
  0x99   :  { %v289_v12 = vpop.trf.xlu0 }
  0x9a   :  { %v414_v16 = vmul.f32 %v289_v12, %v24_v1  ;;  %v401_v21 = vmul.f32 %v289_v12, %v33_v18 }
  0x9c   :  { %v416_v19 = vsel %vm34_vm0, %v414_v16, 0.0  ;;  %v403_v23 = vsel %vm34_vm0, %v401_v21, 0.0 }
  0x9d   :  { %v417_v22 = vadd.f32 %v416_v19, %v415_v15  ;;  %v404_v25 = vadd.f32 %v403_v23, %v402_v20 }
  0x9f   :  { %v418_v24 = vrot.slane %v417_v22, 4  ;;  %v405_v27 = vrot.slane %v404_v25, 4 }
  0xa1   :  { %v419_v26 = vadd.f32 %v418_v24, %v417_v22  ;;  %v406_v29 = vadd.f32 %v405_v27, %v404_v25 }
  0xa3   :  { %v420_v28 = vrot.slane %v419_v26, 2  ;;  %v407_v31 = vrot.slane %v406_v29, 2 }
  0xa5   :  { %v421_v30 = vadd.f32 %v420_v28, %v419_v26  ;;  %v408_v33 = vadd.f32 %v407_v31, %v406_v29 }
  0xa7   :  { %v422_v32 = vrot.slane %v421_v30, 1  ;;  %v409_v35 = vrot.slane %v408_v33, 1 }
  0xa9   :  { %v423_v34 = vadd.f32 %v422_v32, %v421_v30  ;;  %v410_v36 = vadd.f32 %v409_v35, %v408_v33 }
  0xab   :  { %424 = vst.msk [vmem:[#allocation5 + $0x1] sm:$0x1] %vm411_vm3, %v423_v34  ;;  %412 = vst.msk [vmem:[#allocation5] sm:$0x1] %vm411_vm3, %v410_v36 }
  0xed   :  { %v646_v3 = vpop.f32.mrb[0].mxu0 }
  0xee   :  { %v648_v4 = vpop.f32.mrb[1].mxu0 }
  0xef   :  { %304 = vxpose.xlu1.b32.start [1/2] (short) (narrow) %v648_v4, 16  ;;  %548 = vmatprep.mubr.msk.f32.mxu0 %vm34_vm0, %v648_v4  ;;  %v555_v5 = vpack.c.bf16 %v646_v3, %v648_v4 }
  0xf1   :  { %556 = vmatprep.subr.bf16.mxu1 %v555_v5  ;;  %560 = vmatprep.subr.bf16.mxu0 %v555_v5 }
  0xf2   :  { %558 = vmatpush3.bf16.msra.mxu1 %v555_v5  ;;  %562 = vmatpush3.bf16.msra.mxu0 %v555_v5 }
  0xf3   :  { %305 = vxpose.xlu1.b32.end [2/2] (short) (narrow) %v646_v3, 16 }
  0xf5   :  { %542 = vmatmul.mubr.msk.f32.vlgmr.msra.gmra.mrb[0].mxu1 %vm34_vm0, %v24_v1  ;;  %549 = vmatmul.mubr.msk.f32.vlgmr.msra.gmra.mrb[2].mxu0 %vm34_vm0, %v646_v3 }
 0x16f   :  { %v320_v37 = vpop.trf.xlu1 }
 0x170   :  { %v425_v38 = vmul.f32 %v320_v37, %v23_v0  ;;  %v437_v39 = vmul.f32 %v320_v37, %v648_v4 }
 0x172   :  { %v427_v41 = vsel %vm34_vm0, %v425_v38, 0.0  ;;  %v439_v44 = vsel %vm34_vm0, %v437_v39, 0.0 }
 0x173   :  { %v321_v40 = vpop.trf.xlu1 }
 0x174   :  { %v426_v42 = vmul.f32 %v321_v40, %v24_v1  ;;  %v438_v43 = vmul.f32 %v646_v3, %v321_v40 }
 0x176   :  { %v428_v45 = vsel %vm34_vm0, %v426_v42, 0.0  ;;  %v440_v46 = vsel %vm34_vm0, %v438_v43, 0.0 }
 0x177   :  { %v429_v47 = vadd.f32 %v428_v45, %v427_v41  ;;  %v441_v48 = vadd.f32 %v440_v46, %v439_v44 }
 0x179   :  { %v430_v49 = vrot.slane %v429_v47, 4  ;;  %v442_v50 = vrot.slane %v441_v48, 4 }
 0x17b   :  { %v431_v51 = vadd.f32 %v430_v49, %v429_v47  ;;  %v443_v52 = vadd.f32 %v442_v50, %v441_v48 }
 0x17d   :  { %v432_v53 = vrot.slane %v431_v51, 2  ;;  %v444_v54 = vrot.slane %v443_v52, 2 }
 0x17f   :  { %v433_v55 = vadd.f32 %v432_v53, %v431_v51  ;;  %v445_v56 = vadd.f32 %v444_v54, %v443_v52 }
 0x181   :  { %v434_v57 = vrot.slane %v433_v55, 1  ;;  %v446_v58 = vrot.slane %v445_v56, 1 }
 0x183   :  { %v435_v59 = vadd.f32 %v434_v57, %v433_v55  ;;  %v447_v60 = vadd.f32 %v446_v58, %v445_v56 }
 0x185   :  { %436 = vst.msk [vmem:[#allocation5 + $0x2] sm:$0x1] %vm411_vm3, %v435_v59  ;;  %448 = vst.msk [vmem:[#allocation5 + $0x3] sm:$0x1] %vm411_vm3, %v447_v60 }
 0x1c8   :  { %v543_v61 = vpop.f32.mrb[0].mxu1  ;;  %v550_v62 = vpop.f32.mrb[2].mxu0 }
 0x1c9   :  { %v182_v63 = vpop.f32.mrb[1].mxu1  ;;  %v263_v0 = vpop.f32.mrb[3].mxu0 }
 0x1ca   :  { %368 = vxpose.xlu1.b32.start [1/2] (short) (narrow) %v263_v0, 16  ;;  %336 = vxpose.xlu0.b32.start [1/2] (short) (narrow) %v182_v63, 16 }
 0x1ce   :  { %369 = vxpose.xlu1.b32.end [2/2] (short) (narrow) %v550_v62, 16  ;;  %337 = vxpose.xlu0.b32.end [2/2] (short) (narrow) %v543_v61, 16 }
 0x24a   :  { %v384_v1 = vpop.trf.xlu1  ;;  %v352_v2 = vpop.trf.xlu0 }
 0x24b   :  { %v473_v5 = vmul.f32 %v384_v1, %v182_v63  ;;  %v485_v6 = vmul.f32 %v384_v1, %v263_v0  ;;  %v449_v7 = vmul.f32 %v352_v2, %v648_v4  ;;  %v461_v8 = vmul.f32 %v352_v2, %v182_v63 }
 0x24d   :  { %v475_v15 = vsel %vm34_vm0, %v473_v5, 0.0  ;;  %v487_v16 = vsel %vm34_vm0, %v485_v6, 0.0  ;;  %v451_v17 = vsel %vm34_vm0, %v449_v7, 0.0  ;;  %v463_v18 = vsel %vm34_vm0, %v461_v8, 0.0 }
 0x24e   :  { %v385_v9 = vpop.trf.xlu1  ;;  %v353_v10 = vpop.trf.xlu0 }
 0x24f   :  { %v474_v11 = vmul.f32 %v543_v61, %v385_v9  ;;  %v486_v12 = vmul.f32 %v550_v62, %v385_v9  ;;  %v450_v13 = vmul.f32 %v646_v3, %v353_v10  ;;  %v462_v14 = vmul.f32 %v543_v61, %v353_v10 }
 0x251   :  { %v476_v19 = vsel %vm34_vm0, %v474_v11, 0.0  ;;  %v488_v4 = vsel %vm34_vm0, %v486_v12, 0.0  ;;  %v452_v20 = vsel %vm34_vm0, %v450_v13, 0.0  ;;  %v464_v21 = vsel %vm34_vm0, %v462_v14, 0.0 }
 0x252   :  { %v477_v22 = vadd.f32 %v476_v19, %v475_v15  ;;  %v489_v23 = vadd.f32 %v488_v4, %v487_v16  ;;  %v453_v3 = vadd.f32 %v452_v20, %v451_v17  ;;  %v465_v24 = vadd.f32 %v464_v21, %v463_v18 }
 0x254   :  { %v478_v25 = vrot.slane %v477_v22, 4  ;;  %v490_v26 = vrot.slane %v489_v23, 4  ;;  %v454_v27 = vrot.slane %v453_v3, 4  ;;  %v466_v28 = vrot.slane %v465_v24, 4 }
 0x256   :  { %v479_v29 = vadd.f32 %v478_v25, %v477_v22  ;;  %v491_v30 = vadd.f32 %v490_v26, %v489_v23  ;;  %v455_v31 = vadd.f32 %v454_v27, %v453_v3  ;;  %v467_v32 = vadd.f32 %v466_v28, %v465_v24 }
 0x258   :  { %v480_v33 = vrot.slane %v479_v29, 2  ;;  %v492_v34 = vrot.slane %v491_v30, 2  ;;  %v456_v35 = vrot.slane %v455_v31, 2  ;;  %v468_v36 = vrot.slane %v467_v32, 2 }
 0x25a   :  { %v481_v37 = vadd.f32 %v480_v33, %v479_v29  ;;  %v493_v38 = vadd.f32 %v492_v34, %v491_v30  ;;  %v457_v39 = vadd.f32 %v456_v35, %v455_v31  ;;  %v469_v40 = vadd.f32 %v468_v36, %v467_v32 }
 0x25c   :  { %v482_v41 = vrot.slane %v481_v37, 1  ;;  %v494_v42 = vrot.slane %v493_v38, 1  ;;  %v458_v43 = vrot.slane %v457_v39, 1  ;;  %v470_v44 = vrot.slane %v469_v40, 1 }
 0x25e   :  { %v483_v45 = vadd.f32 %v482_v41, %v481_v37  ;;  %v495_v46 = vadd.f32 %v494_v42, %v493_v38  ;;  %v459_v47 = vadd.f32 %v458_v43, %v457_v39  ;;  %v471_v48 = vadd.f32 %v470_v44, %v469_v40 }
 0x260   :  { %484 = vst.msk [vmem:[#allocation5 + $0x6] sm:$0x1] %vm411_vm3, %v483_v45  ;;  %496 = vst.msk [vmem:[#allocation5 + $0x7] sm:$0x1] %vm411_vm3, %v495_v46 }
 0x261   :  { %460 = vst.msk [vmem:[#allocation5 + $0x4] sm:$0x1] %vm411_vm3, %v459_v47  ;;  %472 = vst.msk [vmem:[#allocation5 + $0x5] sm:$0x1] %vm411_vm3, %v471_v48 }
 0x262   :  { %601 = shalt.err (!%p598_p12)
}
 0x263   :  { %s602_s24 = scalar_lea.hbm %s700_s1, 128 }
 0x264   :  { %p603_p13 = scmp.ne.s32.totalorder %s700_s1, %s602_s24  ;;  %p606_p0 = scmp.lt.u32.totalorder %s602_s24, %s700_s1 }
 0x266   :  { %p608_p1 = pnand %p606_p0, %p603_p13 }
 0x268   :  { %611 = shalt.err (!%p608_p1)
}
 0x269   :  { %506 = dma.vmem_to_hbm [thread:$0]  %s504_s20, 128, %s700_s1, [#allocation4]  }
 0x26a   :  { %614 = dma.done.wait [#allocation4], 128  }
 0x26b   :  { %615 = vsyncadd [#allocation4], 4294967168 }
 0x26c   :  { %510 = vsyncpa [#allocation3], 1 }
 0x26d   :  { %511 = vsyncpa [#allocation4], 1 }

</bundles_post_ra>
